<compile_context>
chip_gen: v7x
topology: tpu7x:2x2x1
jax: 0.10.0
libtpu: 0.0.40
codegen_flags: <defaults>
</compile_context>

<pallas_src>
import jax
import jax.numpy as jnp
from jax.experimental import pallas as pl
from jax.experimental.pallas import tpu as pltpu


_LAYER_DIMS = [(2, 64), (64, 32), (32, 8), (8, 1)]  # (fan_in, fan_out) per layer


def _mlp_kernel(x_ref,
                w1_ref, b1_ref,
                w2_ref, b2_ref,
                w3_ref, b3_ref,
                w4_ref, b4_ref,
                o_ref):
    # Layouts (batch on the lane axis):
    #   x_ref : (2, TB) f32          w1_ref: (64, 2) f32   b1_ref: (64, 1) f32
    #   w2_ref: (32, 64) bf16        b2_ref: (32, 1) f32
    #   w3_ref: (8, 32)  bf16        b3_ref: (8, 1)  f32
    #   w4_ref: (8, 1)   f32         b4_ref: (1, 1)  f32
    #   o_ref : (1, TB) f32

    # ---- Layer 1 (2 -> 64): VPU broadcast-MACs. K=2 would waste an entire 128-wide
    #      MXU pass; two broadcast multiply-adds in the VALU slot are nearly free. ----
    h1 = (w1_ref[:, 0:1] * x_ref[0:1, :]
          + w1_ref[:, 1:2] * x_ref[1:2, :]
          + b1_ref[...])
    h1 = jnp.maximum(h1, 0.0)

    # ---- Layers 2-3 (64 -> 32 -> 8): MXU, bf16 operands, f32 accumulation. ----
    h2 = jnp.dot(w2_ref[...], h1.astype(jnp.bfloat16),
                 preferred_element_type=jnp.float32) + b2_ref[...]
    h2 = jnp.maximum(h2, 0.0)

    h3 = jnp.dot(w3_ref[...], h2.astype(jnp.bfloat16),
                 preferred_element_type=jnp.float32) + b3_ref[...]
    h3 = jnp.maximum(h3, 0.0)

    # ---- Layer 4 (8 -> 1): VPU multiply + cross-sublane reduce (XLU slot has slack).
    #      Output dim 1 / K=8 would be ~0.05% MXU utilization otherwise. ----
    out = jnp.sum(w4_ref[...] * h3, axis=0, keepdims=True) + b4_ref[...]
    o_ref[...] = out.astype(o_ref.dtype)


def _round_up(x, m):
    return ((x + m - 1) // m) * m


def _cdiv(a, b):
    return (a + b - 1) // b


@jax.jit
def regression_mlp_forward(x, params):
    """x: (B, 2) float32. params: wN stored (out, in), bN stored (out, 1)."""
    B = x.shape[0]

    # Transpose to (features, B) so the batch maps to TPU lanes.
    # TODO(synk): accept x already in (2, B) layout from the producer to skip this
    # wrapper-side transpose/pad HBM copy (low priority; kernel is compute-bound).
    xt = x.T                                   # (2, B)

    # --- Tile-size selection (minimize padding, enable dual-TC sharding on v7x) ---
    TB_MAX = 4096                              # lane tile; keeps VMEM modest on all gens
    b128 = _round_up(B, 128)
    min_tiles = 2 if b128 >= 256 else 1        # >=2 grid steps when batch spans >=2 tiles
    n_tiles = max(min_tiles, _cdiv(b128, TB_MAX))
    TB = _round_up(_cdiv(B, n_tiles), 128)     # multiple of 128, <= TB_MAX
    Bp = n_tiles * TB                          # small padding (<= n_tiles*128-ish)
    if Bp != B:
        xt = jnp.pad(xt, ((0, 0), (0, Bp - B)))

    # bf16 operands for the two MXU layers (f32 accumulation inside the kernel).
    w2 = params["w2"].astype(jnp.bfloat16)
    w3 = params["w3"].astype(jnp.bfloat16)
    w4 = params["w4"].reshape(8, 1)            # (1, 8) -> (8, 1) column for VPU reduce

    args = (xt,
            params["w1"], params["b1"],
            w2, params["b2"],
            w3, params["b3"],
            w4, params["b4"])

    # Weights/biases: full-array blocks, constant index map -> stay VMEM-resident.
    def weight_spec(arr):
        return pl.BlockSpec(arr.shape, lambda i: (0, 0))

    # Accurate cost hint; note this custom call is MXU-issue-bound, not mem-bound.
    flops = 2 * Bp * sum(fin * fout for fin, fout in _LAYER_DIMS)
    param_bytes = sum(a.size * a.dtype.itemsize for a in args[1:])
    bytes_accessed = 4 * (2 * Bp) + 4 * (1 * Bp) + param_bytes

    out_t = pl.pallas_call(
        _mlp_kernel,
        out_shape=jax.ShapeDtypeStruct((1, Bp), jnp.float32),
        grid=(Bp // TB,),
        in_specs=[pl.BlockSpec((2, TB), lambda i: (0, i))]
                 + [weight_spec(a) for a in args[1:]],
        out_specs=pl.BlockSpec((1, TB), lambda i: (0, i)),
        compiler_params=pltpu.CompilerParams(
            dimension_semantics=("parallel",)),
        cost_estimate=pl.CostEstimate(
            flops=flops, transcendentals=0, bytes_accessed=bytes_accessed),
    )(*args)

    # Back to the PyTorch layout (B, 1); slice off batch padding right at the call.
    return out_t[:, :B].T


def init_params(key):
    """Deterministic init matching nn.Linear default: U(-1/sqrt(in), 1/sqrt(in)).

    Weights are stored (out_features, in_features) and biases (out_features, 1).
    """
    params = {}
    for i, (fin, fout) in enumerate(_LAYER_DIMS, start=1):
        key, kw, kb = jax.random.split(key, 3)
        bound = 1.0 / jnp.sqrt(float(fin))
        params[f"w{i}"] = jax.random.uniform(kw, (fout, fin), jnp.float32,
                                             minval=-bound, maxval=bound)
        params[f"b{i}"] = jax.random.uniform(kb, (fout, 1), jnp.float32,
                                             minval=-bound, maxval=bound)
    return params


def _reference_forward(x, params):
    # Pure-f32 reference matching the PyTorch module.
    h = jnp.maximum(x @ params["w1"].T + params["b1"].T, 0.0)
    h = jnp.maximum(h @ params["w2"].T + params["b2"].T, 0.0)
    h = jnp.maximum(h @ params["w3"].T + params["b3"].T, 0.0)
    return h @ params["w4"].T + params["b4"].T


if __name__ == "__main__":
    key = jax.random.PRNGKey(0)
    kp, kx = jax.random.split(key)
    params = init_params(kp)
    x = jax.random.normal(kx, (8, 2), jnp.float32)  # batch=8, features=2

    out = regression_mlp_forward(x, params)
    out = jax.block_until_ready(out)

    ref = _reference_forward(x, params)
    assert out.shape == (8, 1), f"bad shape {out.shape}"
    # Tolerance loosened vs pure-f32 reference because layers 2-3 run in bf16 on the
    # MXU (f32 accumulation); observed error is ~1e-3 for these magnitudes.
    assert jnp.allclose(out, ref, atol=5e-2, rtol=5e-2), "mismatch vs reference"
    print("KERNEL_OK")
</pallas_src>

<mosaic_0001>
module attributes {stable_mosaic.version = 11 : i64} {
  func.func @_mlp_kernel(%arg0: i32, %arg1: memref<2x128xf32, #tpu.memory_space<vmem>>, %arg2: memref<64x2xf32, #tpu.memory_space<vmem>>, %arg3: memref<64x1xf32, #tpu.memory_space<vmem>>, %arg4: memref<32x64xbf16, #tpu.memory_space<vmem>>, %arg5: memref<32x1xf32, #tpu.memory_space<vmem>>, %arg6: memref<8x32xbf16, #tpu.memory_space<vmem>>, %arg7: memref<8x1xf32, #tpu.memory_space<vmem>>, %arg8: memref<8x1xf32, #tpu.memory_space<vmem>>, %arg9: memref<1x1xf32, #tpu.memory_space<vmem>>, %arg10: memref<1x128xf32, #tpu.memory_space<vmem>>) attributes {dimension_semantics = [#tpu.dimension_semantics<parallel>], iteration_bounds = array<i64: 1>, scalar_prefetch = 0 : i64, scratch_operands = 0 : i64, tpu.core_type = #tpu.core_type<tc>, window_params = [{transform_indices = @transform_0, window_bounds = array<i64: 2, 128>}, {pipeline_mode = #tpu.pipeline_mode<synchronous>, transform_indices = @transform_1, window_bounds = array<i64: 64, 2>}, {pipeline_mode = #tpu.pipeline_mode<synchronous>, transform_indices = @transform_2, window_bounds = array<i64: 64, 1>}, {pipeline_mode = #tpu.pipeline_mode<synchronous>, transform_indices = @transform_3, window_bounds = array<i64: 32, 64>}, {pipeline_mode = #tpu.pipeline_mode<synchronous>, transform_indices = @transform_4, window_bounds = array<i64: 32, 1>}, {pipeline_mode = #tpu.pipeline_mode<synchronous>, transform_indices = @transform_5, window_bounds = array<i64: 8, 32>}, {pipeline_mode = #tpu.pipeline_mode<synchronous>, transform_indices = @transform_6, window_bounds = array<i64: 8, 1>}, {pipeline_mode = #tpu.pipeline_mode<synchronous>, transform_indices = @transform_7, window_bounds = array<i64: 8, 1>}, {pipeline_mode = #tpu.pipeline_mode<synchronous>, transform_indices = @transform_8, window_bounds = array<i64: 1, 1>}, {transform_indices = @transform_9, window_bounds = array<i64: 1, 128>}]} {
    %c0 = arith.constant 0 : index
    %c0_0 = arith.constant 0 : index
    %0 = vector.load %arg2[%c0, %c0_0] : memref<64x2xf32, #tpu.memory_space<vmem>>, vector<64x1xf32>
    %c0_1 = arith.constant 0 : index
    %c0_2 = arith.constant 0 : index
    %1 = vector.load %arg1[%c0_1, %c0_2] : memref<2x128xf32, #tpu.memory_space<vmem>>, vector<1x128xf32>
    %2 = vector.broadcast %0 : vector<64x1xf32> to vector<64x128xf32>
    %3 = vector.broadcast %1 : vector<1x128xf32> to vector<64x128xf32>
    %4 = arith.mulf %2, %3 : vector<64x128xf32>
    %c0_3 = arith.constant 0 : index
    %c1 = arith.constant 1 : index
    %5 = vector.load %arg2[%c0_3, %c1] : memref<64x2xf32, #tpu.memory_space<vmem>>, vector<64x1xf32>
    %c1_4 = arith.constant 1 : index
    %c0_5 = arith.constant 0 : index
    %6 = vector.load %arg1[%c1_4, %c0_5] : memref<2x128xf32, #tpu.memory_space<vmem>>, vector<1x128xf32>
    %7 = vector.broadcast %5 : vector<64x1xf32> to vector<64x128xf32>
    %8 = vector.broadcast %6 : vector<1x128xf32> to vector<64x128xf32>
    %9 = arith.mulf %7, %8 : vector<64x128xf32>
    %10 = arith.addf %4, %9 : vector<64x128xf32>
    %c0_6 = arith.constant 0 : index
    %c0_7 = arith.constant 0 : index
    %11 = vector.load %arg3[%c0_6, %c0_7] : memref<64x1xf32, #tpu.memory_space<vmem>>, vector<64x1xf32>
    %12 = vector.broadcast %11 : vector<64x1xf32> to vector<64x128xf32>
    %13 = arith.addf %10, %12 : vector<64x128xf32>
    %cst = arith.constant 0.000000e+00 : f32
    %14 = vector.broadcast %cst : f32 to vector<64x128xf32>
    %15 = arith.maximumf %13, %14 : vector<64x128xf32>
    %c0_8 = arith.constant 0 : index
    %c0_9 = arith.constant 0 : index
    %16 = vector.load %arg4[%c0_8, %c0_9] : memref<32x64xbf16, #tpu.memory_space<vmem>>, vector<32x64xbf16>
    %17 = arith.truncf %15 : vector<64x128xf32> to vector<64x128xbf16>
    %cst_10 = arith.constant dense<0.000000e+00> : vector<32x128xf32>
    %18 = tpu.matmul %16, %17, %cst_10 {dimension_numbers = #tpu.dot_dimension_numbers<[1], [0], [0], [1], [0, 0, 1, 1], [], []>} : vector<32x64xbf16>, vector<64x128xbf16>, vector<32x128xf32> -> vector<32x128xf32>
    %c0_11 = arith.constant 0 : index
    %c0_12 = arith.constant 0 : index
    %19 = vector.load %arg5[%c0_11, %c0_12] : memref<32x1xf32, #tpu.memory_space<vmem>>, vector<32x1xf32>
    %20 = vector.broadcast %19 : vector<32x1xf32> to vector<32x128xf32>
    %21 = arith.addf %18, %20 : vector<32x128xf32>
    %cst_13 = arith.constant 0.000000e+00 : f32
    %22 = vector.broadcast %cst_13 : f32 to vector<32x128xf32>
    %23 = arith.maximumf %21, %22 : vector<32x128xf32>
    %c0_14 = arith.constant 0 : index
    %c0_15 = arith.constant 0 : index
    %24 = vector.load %arg6[%c0_14, %c0_15] : memref<8x32xbf16, #tpu.memory_space<vmem>>, vector<8x32xbf16>
    %25 = arith.truncf %23 : vector<32x128xf32> to vector<32x128xbf16>
    %cst_16 = arith.constant dense<0.000000e+00> : vector<8x128xf32>
    %26 = tpu.matmul %24, %25, %cst_16 {dimension_numbers = #tpu.dot_dimension_numbers<[1], [0], [0], [1], [0, 0, 1, 1], [], []>} : vector<8x32xbf16>, vector<32x128xbf16>, vector<8x128xf32> -> vector<8x128xf32>
    %c0_17 = arith.constant 0 : index
    %c0_18 = arith.constant 0 : index
    %27 = vector.load %arg7[%c0_17, %c0_18] : memref<8x1xf32, #tpu.memory_space<vmem>>, vector<8x1xf32>
    %28 = vector.broadcast %27 : vector<8x1xf32> to vector<8x128xf32>
    %29 = arith.addf %26, %28 : vector<8x128xf32>
    %cst_19 = arith.constant 0.000000e+00 : f32
    %30 = vector.broadcast %cst_19 : f32 to vector<8x128xf32>
    %31 = arith.maximumf %29, %30 : vector<8x128xf32>
    %c0_20 = arith.constant 0 : index
    %c0_21 = arith.constant 0 : index
    %32 = vector.load %arg8[%c0_20, %c0_21] : memref<8x1xf32, #tpu.memory_space<vmem>>, vector<8x1xf32>
    %33 = vector.broadcast %32 : vector<8x1xf32> to vector<8x128xf32>
    %34 = arith.mulf %33, %31 : vector<8x128xf32>
    %cst_22 = arith.constant dense<0.000000e+00> : vector<128xf32>
    %35 = vector.multi_reduction <add>, %34, %cst_22 [0] : vector<8x128xf32> to vector<128xf32>
    %36 = vector.shape_cast %35 : vector<128xf32> to vector<1x128xf32>
    %c0_23 = arith.constant 0 : index
    %c0_24 = arith.constant 0 : index
    %37 = vector.load %arg9[%c0_23, %c0_24] : memref<1x1xf32, #tpu.memory_space<vmem>>, vector<1x1xf32>
    %38 = vector.broadcast %37 : vector<1x1xf32> to vector<1x128xf32>
    %39 = arith.addf %36, %38 : vector<1x128xf32>
    %c0_25 = arith.constant 0 : index
    %c0_26 = arith.constant 0 : index
    %40 = vector.load %arg10[%c0_25, %c0_26] : memref<1x128xf32, #tpu.memory_space<vmem>>, vector<1x128xf32>
    tpu.vector_store %arg10[%c0_25, %c0_26], %39 {strides = array<i32>} : memref<1x128xf32, #tpu.memory_space<vmem>>, vector<1x128xf32>,
    return
  }
  func.func @transform_0(%arg0: i32) -> (i32, i32) {
    %c0_i32 = arith.constant 0 : i32
    %c0_i32_0 = arith.constant 0 : i32
    return %c0_i32, %arg0 : i32, i32
  }
  func.func @transform_1(%arg0: i32) -> (i32, i32) {
    %c0_i32 = arith.constant 0 : i32
    %c0_i32_0 = arith.constant 0 : i32
    %c0_i32_1 = arith.constant 0 : i32
    return %c0_i32, %c0_i32_0 : i32, i32
  }
  func.func @transform_2(%arg0: i32) -> (i32, i32) {
    %c0_i32 = arith.constant 0 : i32
    %c0_i32_0 = arith.constant 0 : i32
    %c0_i32_1 = arith.constant 0 : i32
    return %c0_i32, %c0_i32_0 : i32, i32
  }
  func.func @transform_3(%arg0: i32) -> (i32, i32) {
    %c0_i32 = arith.constant 0 : i32
    %c0_i32_0 = arith.constant 0 : i32
    %c0_i32_1 = arith.constant 0 : i32
    return %c0_i32, %c0_i32_0 : i32, i32
  }
  func.func @transform_4(%arg0: i32) -> (i32, i32) {
    %c0_i32 = arith.constant 0 : i32
    %c0_i32_0 = arith.constant 0 : i32
    %c0_i32_1 = arith.constant 0 : i32
    return %c0_i32, %c0_i32_0 : i32, i32
  }
  func.func @transform_5(%arg0: i32) -> (i32, i32) {
    %c0_i32 = arith.constant 0 : i32
    %c0_i32_0 = arith.constant 0 : i32
    %c0_i32_1 = arith.constant 0 : i32
    return %c0_i32, %c0_i32_0 : i32, i32
  }
  func.func @transform_6(%arg0: i32) -> (i32, i32) {
    %c0_i32 = arith.constant 0 : i32
    %c0_i32_0 = arith.constant 0 : i32
    %c0_i32_1 = arith.constant 0 : i32
    return %c0_i32, %c0_i32_0 : i32, i32
  }
  func.func @transform_7(%arg0: i32) -> (i32, i32) {
    %c0_i32 = arith.constant 0 : i32
    %c0_i32_0 = arith.constant 0 : i32
    %c0_i32_1 = arith.constant 0 : i32
    return %c0_i32, %c0_i32_0 : i32, i32
  }
  func.func @transform_8(%arg0: i32) -> (i32, i32) {
    %c0_i32 = arith.constant 0 : i32
    %c0_i32_0 = arith.constant 0 : i32
    %c0_i32_1 = arith.constant 0 : i32
    return %c0_i32, %c0_i32_0 : i32, i32
  }
  func.func @transform_9(%arg0: i32) -> (i32, i32) {
    %c0_i32 = arith.constant 0 : i32
    %c0_i32_0 = arith.constant 0 : i32
    return %c0_i32, %arg0 : i32, i32
  }
}

</mosaic_0001>

<bundles_post_ra>
// kernel: regression_mlp_forward.1
= control target key start
LH: loop header
LB: loop body
LE: loop exit
PB: predicated region body
PF: predicated region fallthrough
CT: control target
= control target key end

     0   :  { %v450_v0 = vmov 1   ;;  %v451_v8 = vmov 0   ;;  %vm255_vm0 = vcmask 523264   ;;  %vm453_vm1 = vmmov 0   ;;  %s593_s1 = inlined_call_operand.vmem [shape: f32[64,2], index: 1, kind: input, shape index: {}]   ;;  %s594_s8 = inlined_call_operand.<no memory space> [shape: f32[1,1], index: 8, kind: input, shape index: {}]   ;;  %s595_s2 = inlined_call_operand.vmem [shape: f32[64,1], index: 2, kind: input, shape index: {}]   ;;  %s596_s4 = inlined_call_operand.vmem [shape: f32[32,1], index: 4, kind: input, shape index: {}]   ;;  %s597_s6 = inlined_call_operand.vmem [shape: f32[8,1], index: 6, kind: input, shape index: {}]   ;;  %s598_s7 = inlined_call_operand.vmem [shape: f32[8,1], index: 7, kind: input, shape index: {}]   ;;  %s599_s3 = inlined_call_operand.vmem [shape: bf16[32,64], index: 3, kind: input, shape index: {}]   ;;  %s600_s0 = inlined_call_operand.vmem [shape: f32[2,128], index: 0, kind: input, shape index: {}]   ;;  %s601_s5 = inlined_call_operand.vmem [shape: bf16[8,32], index: 5, kind: input, shape index: {}]   ;;  %s602_s9 = inlined_call_operand.vmem [shape: f32[1,128], index: 9, kind: output, shape index: {}]  }
   0x1   :  { %440 = vset.pattern.permute.xlu0 %v450_v0  ;;  %438 = vset.pattern.permute.xlu1 %v450_v0  ;;  %v37_v1 = vld [vmem:[%s593_s1 + $0x10] sm:$0xff]  ;;  %v35_v2 = vld [vmem:[%s593_s1] sm:$0xff]  ;;  %v14_v3 = vstv %s594_s8  ;;  %v36_v5 = vld [vmem:[%s593_s1 + $0x8] sm:$0xff]  ;;  %vm324_vm2 = vcmask 261120  }
   0x2   :  { %106 = vperm.xlu0 %440, %v37_v1   ;;  %98 = vperm.xlu1 %438, %v35_v2   ;;  %15 = vst [vmem:[#allocation2] sm:$0x1] %v14_v3  ;;  %v39_v4 = vld [vmem:[%s593_s1 + $0x20] sm:$0xff]  ;;  %v41_v6 = vld [vmem:[%s593_s1 + $0x30] sm:$0xff]  ;;  %v38_v7 = vld [vmem:[%s593_s1 + $0x18] sm:$0xff] }
   0x3   :  { %v149_v9 = vld [vmem:[%s595_s2] sm:$0xff]  ;;  %v150_v10 = vld [vmem:[%s595_s2 + $0x8] sm:$0xff]  ;;  %v152_v12 = vld [vmem:[%s595_s2 + $0x18] sm:$0xff] }
   0x4   :  { %v40_v11 = vld [vmem:[%s593_s1 + $0x28] sm:$0xff]  ;;  %v221_v14 = vld [vmem:[%s596_s4] sm:$0xff]  ;;  %v151_v15 = vld [vmem:[%s595_s2 + $0x10] sm:$0xff] }
   0x5   :  { %v154_v13 = vld [vmem:[%s595_s2 + $0x28] sm:$0xff]  ;;  %v223_v16 = vld [vmem:[%s596_s4 + $0x10] sm:$0xff]  ;;  %v318_v17 = vld [vmem:[%s597_s6] sm:$0xff] }
   0x6   :  { %114 = vperm.xlu0 %440, %v39_v4   ;;  %102 = vperm.xlu1 %438, %v36_v5   ;;  %v42_v18 = vld [vmem:[%s593_s1 + $0x38] sm:$0xff]  ;;  %v153_v20 = vld [vmem:[%s595_s2 + $0x20] sm:$0xff]  ;;  %v155_v21 = vld [vmem:[%s595_s2 + $0x30] sm:$0xff] }
   0x7   :  { %v156_v22 = vld [vmem:[%s595_s2 + $0x38] sm:$0xff]  ;;  %v222_v23 = vld [vmem:[%s596_s4 + $0x8] sm:$0xff]  ;;  %v448_v25 = vld [vmem:[%s599_s3] sm:$0xff]  }
   0x8   :  { %v224_v24 = vld [vmem:[%s596_s4 + $0x18] sm:$0xff]  ;;  %v369_v26 = vld [vmem:[%s598_s7] sm:$0xff]  ;;  %422 = vmatprep.mubr.msk.bf16.mxu0 %vm255_vm0, %v448_v25 }
   0x9   :  { %v382_v19 = vld [vmem:[#allocation2] sm:$0x1]  ;;  %v399_v35 = vld [vmem:[%s600_s0 + $0x1] ss:$0 sm:$0xff] }
   0xa   :  { %122 = vperm.xlu0 %440, %v41_v6   ;;  %439 = vset.pattern.permute.xlu1 %v451_v8  ;;  %v398_v36 = vld [vmem:[%s600_s0] ss:$0 sm:$0xff] }
   0xb   :  { %61 = vperm.xlu1 %439, %v38_v7  }
   0xe   :  { %445 = vset.pattern.permute.xlu0 %v451_v8 }
   0xf   :  { %46 = vperm.xlu0 %445, %v35_v2   ;;  %441 = vset.pattern.permute.xlu1 %v450_v0 }
  0x10   :  { %110 = vperm.xlu1 %441, %v38_v7  }
  0x13   :  { %51 = vperm.xlu0 %445, %v36_v5  }
  0x14   :  { %442 = vset.pattern.permute.xlu1 %v451_v8 }
  0x15   :  { %159 = vperm.xlu1 %442, %v149_v9  }
  0x17   :  { %56 = vperm.xlu0 %445, %v37_v1  }
  0x19   :  { %66 = vperm.xlu1 %442, %v39_v4  }
  0x1b   :  { %164 = vperm.xlu0 %445, %v150_v10  }
  0x1d   :  { %71 = vperm.xlu1 %442, %v40_v11  }
  0x1f   :  { %174 = vperm.xlu0 %445, %v152_v12  }
  0x21   :  { %443 = vset.pattern.permute.xlu1 %v450_v0 }
  0x22   :  { %118 = vperm.xlu1 %443, %v40_v11  }
  0x23   :  { %184 = vperm.xlu0 %445, %v154_v13  }
  0x26   :  { %444 = vset.pattern.permute.xlu1 %v451_v8 }
  0x27   :  { %227 = vperm.xlu0 %445, %v221_v14   ;;  %169 = vperm.xlu1 %444, %v151_v15  }
  0x2b   :  { %237 = vperm.xlu0 %445, %v223_v16   ;;  %76 = vperm.xlu1 %444, %v41_v6  }
  0x2f   :  { %321 = vperm.xlu0 %445, %v318_v17   ;;  %81 = vperm.xlu1 %444, %v42_v18  }
  0x33   :  { %385 = vperm.xlu0 %445, %v382_v19   ;;  %446 = vset.pattern.permute.xlu1 %v450_v0 }
  0x34   :  { %126 = vperm.xlu1 %446, %v42_v18  }
  0x38   :  { %447 = vset.pattern.permute.xlu1 %v451_v8 }
  0x39   :  { %179 = vperm.xlu1 %447, %v153_v20  }
  0x3d   :  { %189 = vperm.xlu1 %447, %v155_v21  }
  0x41   :  { %194 = vperm.xlu1 %447, %v156_v22  }
  0x45   :  { %232 = vperm.xlu1 %447, %v222_v23  }
  0x49   :  { %242 = vperm.xlu1 %447, %v224_v24  }
  0x4d   :  { %372 = vperm.xlu1 %447, %v369_v26  }
  0x81   :  { %v99_v27 = vpop.permute.xlu1 %98  ;;  %v107_v28 = vpop.permute.xlu0 %106 }
  0x82   :  { %v133_v40 = vmul.f32 %v399_v35, %v99_v27  ;;  %v135_v55 = vmul.f32 %v399_v35, %v107_v28 }
  0x85   :  { %v103_v29 = vpop.permute.xlu1 %102  ;;  %v115_v30 = vpop.permute.xlu0 %114 }
  0x86   :  { %v134_v43 = vmul.f32 %v399_v35, %v103_v29  ;;  %v137_v8 = vmul.f32 %v399_v35, %v115_v30 }
  0x89   :  { %v123_v31 = vpop.permute.xlu0 %122 }
  0x8a   :  { %v62_v32 = vpop.permute.xlu1 %61  ;;  %v139_v18 = vmul.f32 %v399_v35, %v123_v31  ;;  %v449_v31 = vld [vmem:[%s599_s3 + $0x8] sm:$0xff]  }
  0x8b   :  { %v91_v56 = vmul.f32 %v398_v36, %v62_v32 }
  0x8e   :  { %v47_v33 = vpop.permute.xlu0 %46 }
  0x8f   :  { %v111_v34 = vpop.permute.xlu1 %110  ;;  %v88_v38 = vmul.f32 %v398_v36, %v47_v33 }
  0x90   :  { %v136_v53 = vmul.f32 %v399_v35, %v111_v34  ;;  %v452_v34 = vmov 0.0  }
  0x91   :  { %v141_v44 = vadd.f32 %v133_v40, %v88_v38  ;;  %426 = vmatprep.subr.bf16.mxu1 %v452_v34  ;;  %430 = vmatprep.mubr.msk.bf16.mxu1 %vm453_vm1, %v452_v34 }
  0x92   :  { %v52_v37 = vpop.permute.xlu0 %51  ;;  %v144_v60 = vadd.f32 %v136_v53, %v91_v56  ;;  %v315_v53 = vld [vmem:[%s601_s5] sm:$0xf] }
  0x93   :  { %v89_v41 = vmul.f32 %v398_v36, %v52_v37 }
  0x94   :  { %v160_v39 = vpop.permute.xlu1 %159 }
  0x95   :  { %v197_v46 = vadd.f32 %v160_v39, %v141_v44  ;;  %v142_v47 = vadd.f32 %v134_v43, %v89_v41 }
  0x96   :  { %v57_v42 = vpop.permute.xlu0 %56 }
  0x97   :  { %v205_v51 = vmax.f32 %v197_v46, 0.0  ;;  %v90_v57 = vmul.f32 %v398_v36, %v57_v42 }
  0x98   :  { %v67_v45 = vpop.permute.xlu1 %66 }
  0x99   :  { %v143_v62 = vadd.f32 %v135_v55, %v90_v57  ;;  %v92_v9 = vmul.f32 %v398_v36, %v67_v45 }
  0x9a   :  { %v165_v48 = vpop.permute.xlu0 %164 }
  0x9b   :  { %v198_v49 = vadd.f32 %v165_v48, %v142_v47  ;;  %v145_v14 = vadd.f32 %v137_v8, %v92_v9 }
  0x9c   :  { %v72_v50 = vpop.permute.xlu1 %71 }
  0x9d   :  { %v206_v52 = vmax.f32 %v198_v49, 0.0  ;;  %v93_v7 = vmul.f32 %v398_v36, %v72_v50 }
  0x9e   :  { %v175_v59 = vpop.permute.xlu0 %174 }
  0x9f   :  { %v217_v54 = vpack.c.bf16 %v206_v52, %v205_v51  ;;  %v200_v61 = vadd.f32 %v175_v59, %v144_v60 }
  0xa1   :  { %v119_v58 = vpop.permute.xlu1 %118  ;;  %414 = vmatprep.subr.bf16.mxu0 %v217_v54  ;;  %v208_v1 = vmax.f32 %v200_v61, 0.0 }
  0xa2   :  { %415 = vmatpush3.bf16.msra.mxu0 %v217_v54  ;;  %v138_v6 = vmul.f32 %v399_v35, %v119_v58  ;;  %v185_v12 = vpop.permute.xlu0 %184 }
  0xa4   :  { %v146_v10 = vadd.f32 %v138_v6, %v93_v7 }
  0xa6   :  { %v170_v63 = vpop.permute.xlu1 %169  ;;  %v202_v13 = vadd.f32 %v185_v12, %v146_v10 }
  0xa7   :  { %v199_v0 = vadd.f32 %v170_v63, %v143_v62  ;;  %v388_v62 = vlaneseq }
  0xa8   :  { %v210_v19 = vmax.f32 %v202_v13, 0.0 }
  0xa9   :  { %v207_v2 = vmax.f32 %v199_v0, 0.0 }
  0xaa   :  { %v77_v3 = vpop.permute.xlu1 %76 }
  0xab   :  { %v218_v4 = vpack.c.bf16 %v208_v1, %v207_v2  ;;  %v94_v16 = vmul.f32 %v398_v36, %v77_v3  ;;  %v389_v1 = vshrl.u32 %v388_v62, 7 }
  0xad   :  { %416 = vmatprep.subr.bf16.mxu0 %v218_v4  ;;  %v147_v25 = vadd.f32 %v139_v18, %v94_v16 }
  0xae   :  { %v82_v5 = vpop.permute.xlu1 %81  ;;  %417 = vmatpush3.bf16.msra.mxu0 %v218_v4  ;;  %v390_v4 = vsub.s32 0, %v389_v1 }
  0xaf   :  { %v95_v23 = vmul.f32 %v398_v36, %v82_v5 }
  0xb3   :  { %v127_v11 = vpop.permute.xlu1 %126 }
  0xb4   :  { %v140_v20 = vmul.f32 %v399_v35, %v127_v11  ;;  %v228_v35 = vpop.permute.xlu0 %227 }
  0xb6   :  { %v148_v27 = vadd.f32 %v140_v20, %v95_v23 }
  0xb8   :  { %v180_v15 = vpop.permute.xlu1 %179  ;;  %v238_v37 = vpop.permute.xlu0 %237 }
  0xb9   :  { %v201_v17 = vadd.f32 %v180_v15, %v145_v14 }
  0xbb   :  { %v209_v21 = vmax.f32 %v201_v17, 0.0 }
  0xbc   :  { %v190_v22 = vpop.permute.xlu1 %189  ;;  %v322_v54 = vpop.permute.xlu0 %321 }
  0xbd   :  { %v219_v24 = vpack.c.bf16 %v210_v19, %v209_v21  ;;  %v203_v26 = vadd.f32 %v190_v22, %v147_v25 }
  0xbf   :  { %418 = vmatprep.subr.bf16.mxu0 %v219_v24  ;;  %v211_v30 = vmax.f32 %v203_v26, 0.0 }
  0xc0   :  { %v195_v28 = vpop.permute.xlu1 %194  ;;  %419 = vmatpush3.bf16.msra.mxu0 %v219_v24  ;;  %v386_v6 = vpop.permute.xlu0 %385 }
  0xc1   :  { %v204_v29 = vadd.f32 %v195_v28, %v148_v27  ;;  %v391_v8 = vrot.slane %v386_v6, %v390_v4 }
  0xc3   :  { %v212_v32 = vmax.f32 %v204_v29, 0.0 }
  0xc4   :  { %v233_v36 = vpop.permute.xlu1 %232 }
  0xc5   :  { %v220_v33 = vpack.c.bf16 %v212_v32, %v211_v30 }
  0xc7   :  { %420 = vmatprep.subr.bf16.mxu0 %v220_v33 }
  0xc8   :  { %421 = vmatpush3.bf16.msra.mxu0 %v220_v33  ;;  %v243_v41 = vpop.permute.xlu1 %242 }
  0xcb   :  { %423 = vmatmul.mubr.msk.bf16.vlgmr.msra.gmra.mrb[0].mxu0 %vm255_vm0, %v449_v31 }
  0xcc   :  { %v373_v61 = vpop.permute.xlu1 %372 }
 0x19e   :  { %v424_v38 = vpop.f32.mrb[0].mxu0 }
 0x19f   :  { %v305_v39 = vadd.f32 %v424_v38, %v238_v37  ;;  %v296_v40 = vpop.f32.mrb[1].mxu0 }
 0x1a0   :  { %v297_v42 = vadd.f32 %v296_v40, %v228_v35  ;;  %v425_v43 = vpop.f32.mrb[2].mxu0 }
 0x1a1   :  { %v308_v44 = vadd.f32 %v425_v43, %v243_v41  ;;  %v299_v45 = vpop.f32.mrb[3].mxu0  ;;  %v313_v47 = vmax.f32 %v305_v39, 0.0 }
 0x1a2   :  { %v300_v46 = vadd.f32 %v299_v45, %v233_v36  ;;  %v311_v49 = vmax.f32 %v297_v42, 0.0 }
 0x1a3   :  { %v314_v48 = vmax.f32 %v308_v44, 0.0 }
 0x1a4   :  { %v312_v50 = vmax.f32 %v300_v46, 0.0 }
 0x1a5   :  { %v317_v51 = vpack.c.bf16 %v314_v48, %v313_v47 }
 0x1a6   :  { %v316_v52 = vpack.c.bf16 %v312_v50, %v311_v49 }
 0x1a8   :  { %427 = vmatpush3.bf16.msra.mxu1 %v316_v52 }
 0x1a9   :  { %428 = vmatprep.subr.bf16.mxu1 %v452_v34 }
 0x1ac   :  { %429 = vmatpush3.bf16.msra.mxu1 %v317_v51 }
 0x1af   :  { %431 = vmatmul.mubr.msk.bf16.vlgmr.msra.gmra.mrb[0].mxu1 %vm324_vm2, %v315_v53 }
 0x282   :  { %v362_v55 = vpop.f32.mrb[0].mxu1 }
 0x283   :  { %v363_v56 = vadd.f32 %v362_v55, %v322_v54  ;;  %v432_v57 = vpop.f32.mrb[1].mxu1 }
 0x284   :  { %v365_v58 = vpop.f32.mrb[2].mxu1 }
 0x285   :  { %v368_v59 = vmax.f32 %v363_v56, 0.0  ;;  %v433_v60 = vpop.f32.mrb[3].mxu1 }
 0x287   :  { %v375_v63 = vmul.f32 %v373_v61, %v368_v59 }
 0x289   :  { %v376_v0 = vrot.slane %v375_v63, 4 }
 0x28b   :  { %v377_v2 = vadd.f32 %v376_v0, %v375_v63 }
 0x28d   :  { %v378_v3 = vrot.slane %v377_v2, 2 }
 0x28f   :  { %v379_v5 = vadd.f32 %v378_v3, %v377_v2 }
 0x291   :  { %v380_v7 = vrot.slane %v379_v5, 1 }
 0x293   :  { %v381_v9 = vadd.f32 %v380_v7, %v379_v5 }
 0x295   :  { %v392_v10 = vadd.f32 %v391_v8, %v381_v9 }
 0x297   :  { %393 = vst [vmem:[%s602_s9] sm:$0x1] %v392_v10 }

</bundles_post_ra>
